<compile_context>
chip_gen: v5e
topology: v5e:2x2
jax: 0.10.0
libtpu: 0.0.40
codegen_flags: <defaults>
</compile_context>

<pallas_src>
from functools import partial

import jax
import jax.numpy as jnp
from jax.experimental import pallas as pl
from jax.experimental.pallas import tpu as pltpu


def _attn_core_kernel(q_ref, k_ref, v_ref, o_ref, attn_ref):
    """One (batch, head, q-tile) grid step: scores, softmax, PV."""
    q = q_ref[0, 0]          # (tq, d_k)  -- already pre-scaled by 1/sqrt(d_k)
    k = k_ref[0, 0]          # (Lk, d_k)
    v = v_ref[0, 0]          # (Lv, d_v)

    # s = q @ k^T  (contract the d_k axis of both; no explicit transpose copy)
    s = jax.lax.dot_general(q, k, (((1,), (1,)), ((), ())),
                            preferred_element_type=jnp.float32)   # (tq, Lk)

    # numerically-stable softmax over Lk
    m = jnp.max(s, axis=-1, keepdims=True)
    e = jnp.exp(s - m)
    l = jnp.sum(e, axis=-1, keepdims=True)
    inv_l = pl.reciprocal(l, approx=True)        # EUP slot (cheap)
    inv_l = inv_l * (2.0 - l * inv_l)            # 1 Newton step -> ~f32 accuracy
    p = e * inv_l                                # (tq, Lk)

    attn_ref[0, 0] = p.astype(attn_ref.dtype)

    o = jnp.dot(p.astype(v.dtype), v, preferred_element_type=jnp.float32)
    o_ref[0, 0] = o.astype(o_ref.dtype)


def _pick_q_tile(L, max_tile=256):
    """Largest power-of-two tile <= max_tile that divides L (else full L)."""
    for t in (256, 128, 64, 32, 16, 8):
        if t <= max_tile and t <= L and L % t == 0:
            return t
    return L


@partial(jax.jit, static_argnames=("n_heads", "d_k", "d_v", "matmul_dtype"))
def multi_head_attention(q, k, v, w_qs, w_ks, w_vs, w_fc, *,
                         n_heads, d_k, d_v, attn_mask=None, matmul_dtype=None):
    """Pallas implementation of MultiHeadAttention.forward.

    q, k, v    : (B, L, d_model)
    w_qs, w_ks : (d_model, n_heads*d_k)   (JAX "x @ W" convention)
    w_vs       : (d_model, n_heads*d_v)
    w_fc       : (n_heads*d_v, d_model)
    Returns (out (B, Lq, d_model), attn_weights (B, n_heads, Lq, Lk)).
    """
    # TODO(synk): attn_mask path not implemented (Optional; example passes None).
    assert attn_mask is None

    B, Lq, Dm = q.shape
    Lk = k.shape[1]
    Lv = v.shape[1]

    # ---- Projections as single big XLA matmuls (full MXU utilization) ----
    qh = (q @ w_qs).reshape(B, Lq, n_heads, d_k).transpose(0, 2, 1, 3)  # (B,H,Lq,dk)
    kh = (k @ w_ks).reshape(B, Lk, n_heads, d_k).transpose(0, 2, 1, 3)  # (B,H,Lk,dk)
    vh = (v @ w_vs).reshape(B, Lv, n_heads, d_v).transpose(0, 2, 1, 3)  # (B,H,Lv,dv)

    # fold 1/sqrt(d_k) into q (Lq*d_k elements instead of Lq*Lk score scaling)
    scale = 1.0 / (float(d_k) ** 0.5)
    qh = qh * jnp.asarray(scale, qh.dtype)

    if matmul_dtype is not None:
        # e.g. jnp.bfloat16 on v6e/v7x: halves operand bytes, ~2x MXU rate,
        # accumulation stays f32 inside the kernel.
        qh = qh.astype(matmul_dtype)
        kh = kh.astype(matmul_dtype)
        vh = vh.astype(matmul_dtype)

    tq = _pick_q_tile(Lq)
    grid = (B, n_heads, Lq // tq)

    o_heads, attn = pl.pallas_call(
        _attn_core_kernel,
        out_shape=(
            jax.ShapeDtypeStruct((B, n_heads, Lq, d_v), jnp.float32),
            jax.ShapeDtypeStruct((B, n_heads, Lq, Lk), jnp.float32),
        ),
        grid_spec=pltpu.PrefetchScalarGridSpec(
            num_scalar_prefetch=0,
            grid=grid,
            in_specs=[
                pl.BlockSpec((1, 1, tq, d_k), lambda b, h, i: (b, h, i, 0)),
                pl.BlockSpec((1, 1, Lk, d_k), lambda b, h, i: (b, h, 0, 0)),
                pl.BlockSpec((1, 1, Lv, d_v), lambda b, h, i: (b, h, 0, 0)),
            ],
            out_specs=[
                pl.BlockSpec((1, 1, tq, d_v), lambda b, h, i: (b, h, i, 0)),
                pl.BlockSpec((1, 1, tq, Lk), lambda b, h, i: (b, h, i, 0)),
            ],
        ),
        # no cross-iteration dependency -> every axis parallel (v7x dual-TC)
        compiler_params=pltpu.CompilerParams(
            dimension_semantics=("parallel", "parallel", "parallel")),
    )(qh, kh, vh)

    # ---- Output projection over concatenated heads as one big XLA matmul ----
    o = o_heads.transpose(0, 2, 1, 3).reshape(B, Lq, n_heads * d_v)
    out = o.astype(q.dtype) @ w_fc

    return out, attn


def _reference(q, k, v, w_qs, w_ks, w_vs, w_fc, n_heads, d_k, d_v):
    """Pure-JAX reference of the same forward pass (for validation)."""
    B, Lq, Dm = q.shape
    qh = (q @ w_qs).reshape(B, Lq, n_heads, d_k).transpose(0, 2, 1, 3)
    kh = (k @ w_ks).reshape(B, -1, n_heads, d_k).transpose(0, 2, 1, 3)
    vh = (v @ w_vs).reshape(B, -1, n_heads, d_v).transpose(0, 2, 1, 3)
    s = jnp.einsum('bhqd,bhkd->bhqk', qh, kh) / jnp.sqrt(jnp.float32(d_k))
    p = jax.nn.softmax(s, axis=-1)
    o = jnp.einsum('bhqk,bhkd->bhqd', p, vh)
    o = o.transpose(0, 2, 1, 3).reshape(B, Lq, n_heads * d_v)
    return o @ w_fc, p


if __name__ == "__main__":
    # small shapes consistent with the module
    B, L, d_model, n_heads, d_k, d_v = 2, 8, 32, 4, 8, 8

    key = jax.random.PRNGKey(0)
    kq, kk, kv, kwq, kwk, kwv, kwf = jax.random.split(key, 7)

    q = jax.random.normal(kq, (B, L, d_model), dtype=jnp.float32)
    k = jax.random.normal(kk, (B, L, d_model), dtype=jnp.float32)
    v = jax.random.normal(kv, (B, L, d_model), dtype=jnp.float32)

    # nn.Linear(..., bias=False) equivalents, stored in x@W convention
    w_qs = 0.1 * jax.random.normal(kwq, (d_model, n_heads * d_k), dtype=jnp.float32)
    w_ks = 0.1 * jax.random.normal(kwk, (d_model, n_heads * d_k), dtype=jnp.float32)
    w_vs = 0.1 * jax.random.normal(kwv, (d_model, n_heads * d_v), dtype=jnp.float32)
    w_fc = 0.1 * jax.random.normal(kwf, (n_heads * d_v, d_model), dtype=jnp.float32)

    out, attn = multi_head_attention(q, k, v, w_qs, w_ks, w_vs, w_fc,
                                     n_heads=n_heads, d_k=d_k, d_v=d_v,
                                     attn_mask=None)
    out = jax.block_until_ready(out)
    attn = jax.block_until_ready(attn)

    out_ref, attn_ref = _reference(q, k, v, w_qs, w_ks, w_vs, w_fc,
                                   n_heads, d_k, d_v)

    assert out.shape == (B, L, d_model)
    assert attn.shape == (B, n_heads, L, L)
    assert jnp.allclose(out, out_ref, atol=1e-4, rtol=1e-4)
    assert jnp.allclose(attn, attn_ref, atol=1e-4, rtol=1e-4)

    print("KERNEL_OK")
</pallas_src>

<mosaic_0001>
module attributes {stable_mosaic.version = 11 : i64} {
  func.func @_attn_core_kernel(%arg0: i32, %arg1: i32, %arg2: i32, %arg3: memref<1x1x8x8xf32, #tpu.memory_space<vmem>>, %arg4: memref<1x1x8x8xf32, #tpu.memory_space<vmem>>, %arg5: memref<1x1x8x8xf32, #tpu.memory_space<vmem>>, %arg6: memref<1x1x8x8xf32, #tpu.memory_space<vmem>>, %arg7: memref<1x1x8x8xf32, #tpu.memory_space<vmem>>) attributes {dimension_semantics = [#tpu.dimension_semantics<parallel>, #tpu.dimension_semantics<parallel>, #tpu.dimension_semantics<parallel>], iteration_bounds = array<i64: 2, 4, 1>, scalar_prefetch = 0 : i64, scratch_operands = 0 : i64, tpu.core_type = #tpu.core_type<tc>, window_params = [{transform_indices = @transform_0, window_bounds = array<i64: 1, 1, 8, 8>}, {transform_indices = @transform_1, window_bounds = array<i64: 1, 1, 8, 8>}, {transform_indices = @transform_2, window_bounds = array<i64: 1, 1, 8, 8>}, {transform_indices = @transform_3, window_bounds = array<i64: 1, 1, 8, 8>}, {transform_indices = @transform_4, window_bounds = array<i64: 1, 1, 8, 8>}]} {
    %c0 = arith.constant 0 : index
    %c0_0 = arith.constant 0 : index
    %c0_1 = arith.constant 0 : index
    %c0_2 = arith.constant 0 : index
    %0 = vector.load %arg3[%c0, %c0_0, %c0_1, %c0_2] : memref<1x1x8x8xf32, #tpu.memory_space<vmem>>, vector<1x1x8x8xf32>
    %1 = vector.shape_cast %0 : vector<1x1x8x8xf32> to vector<8x8xf32>
    %c0_3 = arith.constant 0 : index
    %c0_4 = arith.constant 0 : index
    %c0_5 = arith.constant 0 : index
    %c0_6 = arith.constant 0 : index
    %2 = vector.load %arg4[%c0_3, %c0_4, %c0_5, %c0_6] : memref<1x1x8x8xf32, #tpu.memory_space<vmem>>, vector<1x1x8x8xf32>
    %3 = vector.shape_cast %2 : vector<1x1x8x8xf32> to vector<8x8xf32>
    %c0_7 = arith.constant 0 : index
    %c0_8 = arith.constant 0 : index
    %c0_9 = arith.constant 0 : index
    %c0_10 = arith.constant 0 : index
    %4 = vector.load %arg5[%c0_7, %c0_8, %c0_9, %c0_10] : memref<1x1x8x8xf32, #tpu.memory_space<vmem>>, vector<1x1x8x8xf32>
    %5 = vector.shape_cast %4 : vector<1x1x8x8xf32> to vector<8x8xf32>
    %cst = arith.constant dense<0.000000e+00> : vector<8x8xf32>
    %6 = tpu.matmul %1, %3, %cst {dimension_numbers = #tpu.dot_dimension_numbers<[1], [1], [0], [0], [0, 0, 1, 0], [], []>} : vector<8x8xf32>, vector<8x8xf32>, vector<8x8xf32> -> vector<8x8xf32>
    %cst_11 = arith.constant dense<0xFF800000> : vector<8xf32>
    %7 = vector.multi_reduction <maximumf>, %6, %cst_11 [1] : vector<8x8xf32> to vector<8xf32>
    %8 = vector.shape_cast %7 : vector<8xf32> to vector<8x1xf32>
    %9 = vector.broadcast %8 : vector<8x1xf32> to vector<8x8xf32>
    %10 = arith.subf %6, %9 : vector<8x8xf32>
    %11 = math.exp %10 : vector<8x8xf32>
    %cst_12 = arith.constant dense<0.000000e+00> : vector<8xf32>
    %12 = vector.multi_reduction <add>, %11, %cst_12 [1] : vector<8x8xf32> to vector<8xf32>
    %13 = vector.shape_cast %12 : vector<8xf32> to vector<8x1xf32>
    %14 = tpu.reciprocal %13 {approx = true} : vector<8x1xf32> -> vector<8x1xf32>
    %15 = arith.mulf %13, %14 : vector<8x1xf32>
    %cst_13 = arith.constant 2.000000e+00 : f32
    %16 = vector.broadcast %cst_13 : f32 to vector<8x1xf32>
    %17 = arith.subf %16, %15 : vector<8x1xf32>
    %18 = arith.mulf %14, %17 : vector<8x1xf32>
    %19 = vector.broadcast %18 : vector<8x1xf32> to vector<8x8xf32>
    %20 = arith.mulf %11, %19 : vector<8x8xf32>
    %c0_14 = arith.constant 0 : index
    %c0_15 = arith.constant 0 : index
    %c0_16 = arith.constant 0 : index
    %c0_17 = arith.constant 0 : index
    %21 = vector.load %arg7[%c0_14, %c0_15, %c0_16, %c0_17] : memref<1x1x8x8xf32, #tpu.memory_space<vmem>>, vector<1x1x8x8xf32>
    %22 = vector.shape_cast %21 : vector<1x1x8x8xf32> to vector<8x8xf32>
    %23 = vector.shape_cast %20 : vector<8x8xf32> to vector<1x1x8x8xf32>
    tpu.vector_store %arg7[%c0_14, %c0_15, %c0_16, %c0_17], %23 {strides = array<i32>} : memref<1x1x8x8xf32, #tpu.memory_space<vmem>>, vector<1x1x8x8xf32>,
    %cst_18 = arith.constant dense<0.000000e+00> : vector<8x8xf32>
    %24 = tpu.matmul %20, %5, %cst_18 {dimension_numbers = #tpu.dot_dimension_numbers<[1], [0], [0], [1], [0, 0, 1, 1], [], []>} : vector<8x8xf32>, vector<8x8xf32>, vector<8x8xf32> -> vector<8x8xf32>
    %c0_19 = arith.constant 0 : index
    %c0_20 = arith.constant 0 : index
    %c0_21 = arith.constant 0 : index
    %c0_22 = arith.constant 0 : index
    %25 = vector.load %arg6[%c0_19, %c0_20, %c0_21, %c0_22] : memref<1x1x8x8xf32, #tpu.memory_space<vmem>>, vector<1x1x8x8xf32>
    %26 = vector.shape_cast %25 : vector<1x1x8x8xf32> to vector<8x8xf32>
    %27 = vector.shape_cast %24 : vector<8x8xf32> to vector<1x1x8x8xf32>
    tpu.vector_store %arg6[%c0_19, %c0_20, %c0_21, %c0_22], %27 {strides = array<i32>} : memref<1x1x8x8xf32, #tpu.memory_space<vmem>>, vector<1x1x8x8xf32>,
    return
  }
  func.func @transform_0(%arg0: i32, %arg1: i32, %arg2: i32) -> (i32, i32, i32, i32) {
    %c0_i32 = arith.constant 0 : i32
    %c0_i32_0 = arith.constant 0 : i32
    return %arg0, %arg1, %arg2, %c0_i32 : i32, i32, i32, i32
  }
  func.func @transform_1(%arg0: i32, %arg1: i32, %arg2: i32) -> (i32, i32, i32, i32) {
    %c0_i32 = arith.constant 0 : i32
    %c0_i32_0 = arith.constant 0 : i32
    %c0_i32_1 = arith.constant 0 : i32
    return %arg0, %arg1, %c0_i32, %c0_i32_0 : i32, i32, i32, i32
  }
  func.func @transform_2(%arg0: i32, %arg1: i32, %arg2: i32) -> (i32, i32, i32, i32) {
    %c0_i32 = arith.constant 0 : i32
    %c0_i32_0 = arith.constant 0 : i32
    %c0_i32_1 = arith.constant 0 : i32
    return %arg0, %arg1, %c0_i32, %c0_i32_0 : i32, i32, i32, i32
  }
  func.func @transform_3(%arg0: i32, %arg1: i32, %arg2: i32) -> (i32, i32, i32, i32) {
    %c0_i32 = arith.constant 0 : i32
    %c0_i32_0 = arith.constant 0 : i32
    return %arg0, %arg1, %arg2, %c0_i32 : i32, i32, i32, i32
  }
  func.func @transform_4(%arg0: i32, %arg1: i32, %arg2: i32) -> (i32, i32, i32, i32) {
    %c0_i32 = arith.constant 0 : i32
    %c0_i32_0 = arith.constant 0 : i32
    return %arg0, %arg1, %arg2, %c0_i32 : i32, i32, i32, i32
  }
}

</mosaic_0001>

<bundles_post_ra>
// kernel: multi_head_attention.1
= control target key start
LH: loop header
LB: loop body
LE: loop exit
PB: predicated region body
PF: predicated region fallthrough
CT: control target
= control target key end

     0   :  { %10 = vsyncpa [#allocation3], 0  ;;  %s960_s0 = inlined_call_operand.vmem [shape: f32[2,4,8,8], index: 0, kind: input, shape index: {}]   ;;  %s961_s1 = inlined_call_operand.vmem [shape: f32[2,4,8,8], index: 1, kind: input, shape index: {}]   ;;  %s962_s2 = inlined_call_operand.vmem [shape: f32[2,4,8,8], index: 2, kind: input, shape index: {}]   ;;  %s963_s3 = inlined_call_operand.vmem [shape: f32[2,4,8,8], index: 3, kind: output, shape index: {0}]   ;;  %s964_s4 = inlined_call_operand.hbm [shape: f32[2,4,8,8], index: 4, kind: output, shape index: {1}]  }
   0x1   :  { %12 = vsyncpa [#allocation3 + $0x1], 0  ;;  %s816_s15 = smov 0   ;;  %s818_s16 = smov 0  }
   0x2   :  { %s820_s17 = smov 0   ;;  %s822_s18 = smov 0  }
   0x3   :  { %s824_s19 = smov 0   ;;  %s826_s20 = smov 0  }
   0x4   :  { %s828_s21 = smov 0   ;;  %s830_s22 = smov 0  }
   0x5 LB: > { %s598_s23 = sadd.s32 4294967295, %s789_s22   ;;  %s599_s24 = sadd.s32 4294967294, %s789_s22   ;;  %s789_s22 = sphi %s830_s22, %s18_s22   ;;  %s785_s21 = sphi %s828_s21, %s973_s21   ;;  %s781_s20 = sphi %s826_s20, %s972_s20   ;;  %s777_s19 = sphi %s824_s19, %s971_s19   ;;  %s773_s18 = sphi %s822_s18, %s970_s18   ;;  %s769_s17 = sphi %s820_s17, %s969_s17   ;;  %s765_s16 = sphi %s818_s16, %s968_s16   ;;  %s761_s15 = sphi %s816_s15, %s967_s15  }
   0x6   : > { %s33_s25 = sadd.s32 1, %s781_s20  ;;  %s37_s26 = sadd.s32 1, %s785_s21 }
   0x7   : > { %p35_p0 = scmp.ge.s32.totalorder %s33_s25, 4  ;;  %p174_p1 = scmp.ne.s32.totalorder %s769_s17, %s765_s16 }
   0x8   : > { %p175_p2 = scmp.eq.s32.totalorder %s598_s23, 7  ;;  %p180_p5 = scmp.ne.s32.totalorder %s765_s16, %s761_s15 }
   0x9   : > { %s975_s25 = smov (%p35_p0, %s33_s25), 0  ;;  %s977_s26 = smov (!%p35_p0, %s37_s26), %s785_s21 }
   0xa   : > { %s158_s27 = ssub.s32 %s781_s20, %s975_s25  ;;  %p867_p3 = por %p175_p2, %p174_p1 }
   0xb   : > { %p39_p4 = scmp.ge.s32.totalorder %s977_s26, 2  ;;  %p181_p6 = scmp.eq.s32.totalorder %s599_s24, 7 }
   0xc   : > { %p602_p7 = scmp.ge.s32.totalorder %s789_s22, 1  ;;  %p235_p9 = scmp.lt.s32.totalorder %s789_s22, 9 }
   0xd   : > { %s979_s26 = smov (%p39_p4, %s977_s26), 0  ;;  %p876_p8 = por %p181_p6, %p180_p5 }
   0xe   : > { %s157_s30 = ssub.s32 %s785_s21, %s979_s26  ;;  %s164_s5 = sadd.s32 1, %s769_s17 }
   0xf   : > { %s159_s6 = sor.u32 %s158_s27, %s157_s30  ;;  %p236_p10 = pnand %p602_p7, %p235_p9 }
  0x10   : > { %p162_p11 = scmp.eq.s32.totalorder %s159_s6, 0  ;;  %p294_p12 = scmp.lt.s32.totalorder (!%p236_p10), %s777_s19, 1 }
  0x11   : > { %239 = sbr.rel (%p236_p10) target bundleno = 545 (0x221), region = 32  ;;  %p296_p13 = scmp.lt.s32.totalorder (!%p236_p10), %s773_s18, 3 }
  0x12   : > { %s885_s7 = scalar_select %p162_p11, %s769_s17, %s164_s5  }
  0x16   : > { %s295_s8 = scalar_select %p294_p12, %s777_s19, 1  ;;  %vm335_vm0 = vcmask 64512  }
  0x17   : > { %s297_s9 = scalar_select %p296_p13, %s773_s18, 3 }
  0x18   : > { %s604_s10 = sshll.u32 %s295_s8, 2 }
  0x19   : > { %s302_s11 = sadd.s32 %s604_s10, %s297_s9  ;;  %s291_s9 = sand.u32 1, %s765_s16  }
  0x1a   : > { %s891_s12 = sshll.u32 %s302_s11, 3  ;;  %s603_s10 = sshll.u32 %s291_s9, 3 }
  0x1b   : > { %s312_s23 = scalar_lea.vmem %s961_s1, %s891_s12  ;;  %s304_s30 = scalar_lea.vmem %s960_s0, %s891_s12 }
  0x1c   : > { %v333_v0 = vld [vmem:[%s312_s23] sm:$0xff]  ;;  %s320_s8 = scalar_lea.vmem %s962_s2, %s891_s12  ;;  %s616_s11 = sshll.u32 %s777_s19, 2 }
  0x1d   : > { %612 = vmatpush.xpose.msk.msra.mxu0 %vm335_vm0, %v333_v0  ;;  %v332_v1 = vld [vmem:[%s304_s30] sm:$0xff]  ;;  %s427_s13 = sadd.s32 %s773_s18, %s616_s11  ;;  %s293_s30 = scalar_lea.vmem [#allocation2], %s603_s10 }
  0x1e   : > { %v334_v9 = vld [vmem:[%s320_s8] sm:$0xff]  ;;  %s617_s14 = sshll.u32 %s427_s13, 3  ;;  %s431_s5 = sshll.u32 %s293_s30, 4  ;;  %s432_s5 = int_to_ptr.vmem [resolvable:$true] %s431_s5 }
  0x1f   : > { %395 = vmatpush.msra.mxu1 %v334_v9  ;;  %s429_s27 = scalar_lea.hbm %s964_s4, %s617_s14  ;;  %s413_s19 = scalar_lea.sflag [#allocation3], %s291_s9 }
  0x20   : > { %613 = vmatmul.msk.f32.vlgmr.msra.gmra.mxu0 %vm335_vm0, %v332_v1  ;;  %s433_s6 = sshll.u32 %s429_s27, 4  ;;  %s715_s10 = scalar_lea.hbm %s964_s4, 64  ;;  %s434_s6 = int_to_ptr.hbm [resolvable:$true] %s433_s6 }
  0x21   : > { %s709_s18 = sshra.s32 %s434_s6, 4  ;;  %s710_s18 = int_to_ptr.hbm [resolvable:$true] %s709_s18 }
  0x22   : > { %s711_s8 = scalar_lea.hbm %s710_s18, 8  ;;  %p716_p4 = scmp.lt.s32.totalorder %s710_s18, %s964_s4 }
  0x23   : > { %p712_p0 = scmp.ne.s32.totalorder %s710_s18, %s711_s8  ;;  %p717_p5 = scmp.lt.s32.totalorder %s715_s10, %s711_s8 }
  0x25   : > { %p713_p1 = pnand %p712_p0, %p867_p3  ;;  %p718_p6 = por %p717_p5, %p716_p4 }
  0x27   : > { %p714_p2 = pneg %p713_p1 }
  0x29   : > { %p719_p7 = pnand %p718_p6, %p714_p2 }
  0x9d   : > { %v359_v2 = vpop.f32.mrf.mxu0 }
  0x9e   : > { %v362_v3 = vsel %vm335_vm0, %v359_v2, -inf }
  0x9f   : > { %363 = vmax.xlane.f32.xlu0 %v362_v3 }
 0x112   : > { %v364_v4 = vpop.xlane.xlu0 %363 }
 0x113   : > { %v365_v5 = vsub.f32 %v359_v2, %v364_v4 }
 0x115   : > { %v366_v6 = vmul.f32 1.442695, %v365_v5 }
 0x117   : > { %691 = vpow2.f32 %v366_v6 }
 0x11d   : > { %v692_v7 = vpop.eup %691 }
 0x11e   : > { %v368_v8 = vsel %vm335_vm0, %v692_v7, 0.0 }
 0x11f   : > { %369 = vadd.xlane.f32.xlu0 %v368_v8 }
 0x192   : > { %v370_v10 = vpop.xlane.xlu0 %369 }
 0x193   : > { %693 = vrcp.f32 %v370_v10 }
 0x199   : > { %v694_v11 = vpop.eup %693 }
 0x19a   : > { %v372_v12 = vmul.f32 %v694_v11, %v370_v10 }
 0x19c   : > { %v373_v13 = vsub.f32 2.0, %v372_v12 }
 0x19e   : > { %v374_v14 = vmul.f32 %v694_v11, %v373_v13 }
 0x1a0   : > { %v375_v15 = vmul.f32 %v692_v7, %v374_v14 }
 0x1a2   : > { %614 = vmatmul.msk.f32.vlgmr.msra.gmra.mxu1 %vm335_vm0, %v375_v15  ;;  %376 = vst.msk [vmem:[%s293_s30] sm:$0xff] %vm335_vm0, %v375_v15 }
 0x1a3   : > { %722 = shalt.err (!%p719_p7)
}
 0x1a4   : > { %620 = dma.vmem_to_hbm [thread:$0]  (%p867_p3), %s432_s5, 128, %s434_s6, %s413_s19  }
 0x1a5   : > { %s331_s27 = scalar_lea.vmem %s963_s3, %s891_s12 }
 0x21f   : > { %v397_v16 = vpop.f32.mrf.mxu1 }
 0x220   : > { %400 = vst.msk [vmem:[%s331_s27] sm:$0xff] %vm335_vm0, %v397_v16 }
 0x221 PF: > { %p626_p9 = scmp.ge.s32.totalorder %s789_s22, 2  ;;  %s459_s30 = sand.u32 1, %s761_s15  }
 0x222   : > { %s460_s18 = scalar_lea.sflag [#allocation3], %s459_s30 }
 0x223   : > { %p623_p10 = pnand %p626_p9, %p876_p8 }
 0x225   : > { %p624_p11 = pneg %p623_p10 }
 0x227   : > { %756 = dma.done.wait (%p624_p11), %s460_s18, 128  }
 0x228   : > { %758 = vsyncadd (%p624_p11), %s460_s18, 4294967168  ;;  %s18_s22 = sadd.s32 1, %s789_s22   ;;  %s967_s15 = smov %s765_s16 }
 0x229   : > { %p15_p3 = scmp.ge.s32.totalorder %s18_s22, 10   ;;  %s968_s16 = smov %s769_s17 }
 0x22a   : > { %s969_s17 = smov %s885_s7  ;;  %s970_s18 = smov %s781_s20 }
 0x22b   : > { %s971_s19 = smov %s785_s21  ;;  %s972_s20 = smov %s975_s25 }
 0x22c   : > { %s973_s21 = smov %s979_s26  ;;  %17 = sbr.rel (!%p15_p3) target bundleno = 5 (0x5), region = 85 }
 0x231   :  { %466 = vsyncpa [#allocation3], 1 }
 0x232   :  { %468 = vsyncpa [#allocation3 + $0x1], 1 }

</bundles_post_ra>
